<compile_context>
chip_gen: v5e
topology: v5e:2x2
jax: 0.10.0
libtpu: 0.0.40
codegen_flags: <defaults>
</compile_context>

<pallas_src>
import functools

import jax
import jax.numpy as jnp
from jax import lax
from jax.experimental import pallas as pl
from jax.experimental.pallas import tpu as pltpu


def noisy_linear_kernel(x_ref, wmu_ref, wsig_ref, weps_ref, bias_ref, o_ref):
    k = pl.program_id(2)
    f32 = jnp.float32

    @pl.when(k == 0)
    def _init():
        o_ref[...] = jnp.zeros_like(o_ref)

    # Noisy-weight combine on the VPU in f32 (v5e-safe), MXU input in the
    # storage dtype (bf16 -> full-rate matmul, f32 accumulation).
    w = (wmu_ref[...].astype(f32)
         + wsig_ref[...].astype(f32) * weps_ref[...].astype(f32)
         ).astype(x_ref.dtype)                                  # (bn, bk)

    # Contraction over the last dim of BOTH operands -> no transpose.
    o_ref[...] += lax.dot_general(
        x_ref[...], w,
        dimension_numbers=(((1,), (1,)), ((), ())),
        preferred_element_type=jnp.float32)                     # (bm, bn) f32

    @pl.when(k == pl.num_programs(2) - 1)
    def _finalize():
        bias = bias_ref[...].astype(f32)                        # (3, bn)
        o_ref[...] += bias[0:1, :] + bias[1:2, :] * bias[2:3, :]


def _round_up(x, m):
    return ((x + m - 1) // m) * m


def _pad2(a, rows, cols, dtype):
    """Cast to `dtype`; only materialize a padded copy if shape changes."""
    a = a.astype(dtype)
    if a.shape == (rows, cols):
        return a
    return jnp.zeros((rows, cols), dtype).at[:a.shape[0], :a.shape[1]].set(a)


def noisy_linear(x, weight_mu, weight_sigma, weight_epsilon,
                 bias_mu, bias_sigma, bias_epsilon,
                 *, bm=512, bn=512, bk=2048, weight_dtype=jnp.bfloat16):
    """x: (B, in_f); weight_*: (out_f, in_f); bias_*: (out_f,).  Returns f32."""
    B, in_f = x.shape
    out_f = weight_mu.shape[0]

    elt = jnp.dtype(weight_dtype).itemsize
    sub = 8 * (4 // elt)           # sublane multiple: 8 for f32, 16 for bf16

    # Lane-dense padding targets (only applied if actually needed).
    B_pad = _round_up(B, sub)
    K_pad = _round_up(in_f, 128)
    N_pad = _round_up(out_f, 128)

    # Tile selection.
    bm = min(bm, B_pad)
    # v7x megacore: if the whole batch fits in one bm tile, make sure the N
    # (parallel) axis has >= 2 blocks so both TensorCores get work.
    if B_pad <= bm and N_pad >= 256:
        bn = min(bn, max(128, (N_pad // 2) // 128 * 128))
    bn = min(bn, N_pad)
    bk = min(bk, K_pad)
    B_pad = _round_up(B_pad, bm)
    N_pad = _round_up(N_pad, bn)
    K_pad = _round_up(K_pad, bk)

    xp = _pad2(x, B_pad, K_pad, weight_dtype)
    wmu = _pad2(weight_mu, N_pad, K_pad, weight_dtype)
    wsig = _pad2(weight_sigma, N_pad, K_pad, weight_dtype)
    weps = _pad2(weight_epsilon, N_pad, K_pad, weight_dtype)

    # Pack the three bias vectors into one (3, N_pad) f32 array -> one DMA.
    bias = jnp.zeros((3, N_pad), jnp.float32)
    bias = bias.at[0, :out_f].set(bias_mu.astype(jnp.float32))
    bias = bias.at[1, :out_f].set(bias_sigma.astype(jnp.float32))
    bias = bias.at[2, :out_f].set(bias_epsilon.astype(jnp.float32))

    grid = (B_pad // bm, N_pad // bn, K_pad // bk)

    # VMEM budget from the actual (double-buffered) tile plan, with slack,
    # capped below v7x's 64 MiB per-core capacity.
    tile_bytes = 2 * (bm * bk * elt          # x
                      + 3 * bn * bk * elt    # weight_mu / sigma / epsilon
                      + 3 * bn * 4           # packed bias
                      + bm * bn * 4)         # resident f32 output block
    vmem_limit = min(int(tile_bytes * 1.5) + (4 << 20), 60 << 20)

    out = pl.pallas_call(
        noisy_linear_kernel,
        out_shape=jax.ShapeDtypeStruct((B_pad, N_pad), jnp.float32),
        grid_spec=pltpu.PrefetchScalarGridSpec(
            num_scalar_prefetch=0,
            grid=grid,
            in_specs=[
                pl.BlockSpec((bm, bk), lambda i, j, k: (i, k)),   # x
                pl.BlockSpec((bn, bk), lambda i, j, k: (j, k)),   # weight_mu
                pl.BlockSpec((bn, bk), lambda i, j, k: (j, k)),   # weight_sigma
                pl.BlockSpec((bn, bk), lambda i, j, k: (j, k)),   # weight_epsilon
                pl.BlockSpec((3, bn), lambda i, j, k: (0, j)),    # packed bias
            ],
            out_specs=pl.BlockSpec((bm, bn), lambda i, j, k: (i, j)),
        ),
        compiler_params=pltpu.CompilerParams(
            dimension_semantics=("parallel", "parallel", "arbitrary"),
            vmem_limit_bytes=vmem_limit,
        ),
    )(xp, wmu, wsig, weps, bias)

    return out[:B, :out_f]


def init_noisy_linear_params(key, in_features, out_features, sigma_init=0.017):
    """Deterministic equivalent of NoisyLinear.__init__ + reset_parameters()."""
    k_wmu, k_bmu = jax.random.split(key)
    mu_range = 1.0 / (in_features ** 0.5)
    weight_mu = jax.random.uniform(
        k_wmu, (out_features, in_features), jnp.float32, -mu_range, mu_range)
    bias_mu = jax.random.uniform(
        k_bmu, (out_features,), jnp.float32, -mu_range, mu_range)
    weight_sigma = jnp.full((out_features, in_features), sigma_init, jnp.float32)
    bias_sigma = jnp.full((out_features,), sigma_init, jnp.float32)
    return weight_mu, weight_sigma, bias_mu, bias_sigma


def _reference(x, wmu, wsig, weps, bmu, bsig, beps, dtype):
    """Pure-JAX reference mirroring the kernel's bf16 storage quantization."""
    f32 = jnp.float32
    q = lambda a: a.astype(dtype).astype(f32)
    w = (q(wmu) + q(wsig) * q(weps)).astype(dtype).astype(f32)
    b = bmu + bsig * beps
    return q(x) @ w.T + b


def _run_case(key, batch, in_features, out_features, fwd, **tile_kwargs):
    k_param, k_x, k_weps, k_beps = jax.random.split(key, 4)
    weight_mu, weight_sigma, bias_mu, bias_sigma = init_noisy_linear_params(
        k_param, in_features, out_features, sigma_init=0.017)
    x = jax.random.normal(k_x, (batch, in_features), jnp.float32)
    # forward(): self.weight_epsilon.normal_(); self.bias_epsilon.normal_()
    weight_epsilon = jax.random.normal(
        k_weps, (out_features, in_features), jnp.float32)
    bias_epsilon = jax.random.normal(k_beps, (out_features,), jnp.float32)

    out = fwd(x, weight_mu, weight_sigma, weight_epsilon,
              bias_mu, bias_sigma, bias_epsilon, **tile_kwargs)
    out = jax.block_until_ready(out)
    assert out.shape == (batch, out_features)

    # Tight check vs a reference that applies the same bf16 storage rounding.
    ref_q = _reference(x, weight_mu, weight_sigma, weight_epsilon,
                       bias_mu, bias_sigma, bias_epsilon, jnp.bfloat16)
    assert jnp.allclose(out, ref_q, atol=2e-3, rtol=2e-3)

    # Loose check vs the exact f32 NoisyLinear math (bf16 storage error only).
    w = weight_mu + weight_sigma * weight_epsilon
    b = bias_mu + bias_sigma * bias_epsilon
    ref = x @ w.T + b
    assert jnp.allclose(out, ref, atol=5e-2, rtol=5e-2)


if __name__ == "__main__":
    fwd = jax.jit(noisy_linear,
                  static_argnames=("bm", "bn", "bk", "weight_dtype"))

    # Case 1: small, unaligned layer (exercises the padding path), default tiles.
    _run_case(jax.random.PRNGKey(0), batch=8, in_features=32, out_features=64,
              fwd=fwd)

    # Case 2: aligned shapes with small tile overrides so the grid is
    # multi-block on every axis (validates accumulator reset across (i, j)).
    _run_case(jax.random.PRNGKey(1), batch=32, in_features=384,
              out_features=256, fwd=fwd, bm=16, bn=128, bk=128)

    print("KERNEL_OK")
</pallas_src>

<mosaic_0001>
module attributes {stable_mosaic.version = 11 : i64} {
  func.func @noisy_linear_kernel(%arg0: i32, %arg1: i32, %arg2: i32, %arg3: memref<16x128xbf16, #tpu.memory_space<vmem>>, %arg4: memref<128x128xbf16, #tpu.memory_space<vmem>>, %arg5: memref<128x128xbf16, #tpu.memory_space<vmem>>, %arg6: memref<128x128xbf16, #tpu.memory_space<vmem>>, %arg7: memref<3x128xf32, #tpu.memory_space<vmem>>, %arg8: memref<16x128xf32, #tpu.memory_space<vmem>>) attributes {dimension_semantics = [#tpu.dimension_semantics<parallel>, #tpu.dimension_semantics<parallel>, #tpu.dimension_semantics<arbitrary>], iteration_bounds = array<i64: 1, 1, 1>, scalar_prefetch = 0 : i64, scratch_operands = 0 : i64, tpu.core_type = #tpu.core_type<tc>, window_params = [{transform_indices = @transform_0, window_bounds = array<i64: 16, 128>}, {transform_indices = @transform_1, window_bounds = array<i64: 128, 128>}, {transform_indices = @transform_2, window_bounds = array<i64: 128, 128>}, {transform_indices = @transform_3, window_bounds = array<i64: 128, 128>}, {transform_indices = @transform_4, window_bounds = array<i64: 3, 128>}, {transform_indices = @transform_5, window_bounds = array<i64: 16, 128>}]} {
    %c0_i32 = arith.constant 0 : i32
    %0 = arith.cmpi eq, %arg2, %c0_i32 : i32
    %1 = arith.extui %0 : i1 to i32
    %c0_i32_0 = arith.constant 0 : i32
    %2 = arith.cmpi ne, %1, %c0_i32_0 : i32
    scf.if %2 {
      %cst_14 = arith.constant 0.000000e+00 : f32
      %20 = vector.broadcast %cst_14 : f32 to vector<16x128xf32>
      %c0_15 = arith.constant 0 : index
      %c0_16 = arith.constant 0 : index
      %21 = vector.load %arg8[%c0_15, %c0_16] : memref<16x128xf32, #tpu.memory_space<vmem>>, vector<16x128xf32>
      tpu.vector_store %arg8[%c0_15, %c0_16], %20 {strides = array<i32>} : memref<16x128xf32, #tpu.memory_space<vmem>>, vector<16x128xf32>,
    } else {
    }
    %c0 = arith.constant 0 : index
    %c0_1 = arith.constant 0 : index
    %3 = vector.load %arg4[%c0, %c0_1] : memref<128x128xbf16, #tpu.memory_space<vmem>>, vector<128x128xbf16>
    %4 = arith.extf %3 : vector<128x128xbf16> to vector<128x128xf32>
    %c0_2 = arith.constant 0 : index
    %c0_3 = arith.constant 0 : index
    %5 = vector.load %arg5[%c0_2, %c0_3] : memref<128x128xbf16, #tpu.memory_space<vmem>>, vector<128x128xbf16>
    %6 = arith.extf %5 : vector<128x128xbf16> to vector<128x128xf32>
    %c0_4 = arith.constant 0 : index
    %c0_5 = arith.constant 0 : index
    %7 = vector.load %arg6[%c0_4, %c0_5] : memref<128x128xbf16, #tpu.memory_space<vmem>>, vector<128x128xbf16>
    %8 = arith.extf %7 : vector<128x128xbf16> to vector<128x128xf32>
    %9 = arith.mulf %6, %8 : vector<128x128xf32>
    %10 = arith.addf %4, %9 : vector<128x128xf32>
    %11 = arith.truncf %10 : vector<128x128xf32> to vector<128x128xbf16>
    %c0_6 = arith.constant 0 : index
    %c0_7 = arith.constant 0 : index
    %12 = vector.load %arg8[%c0_6, %c0_7] : memref<16x128xf32, #tpu.memory_space<vmem>>, vector<16x128xf32>
    %c0_8 = arith.constant 0 : index
    %c0_9 = arith.constant 0 : index
    %13 = vector.load %arg3[%c0_8, %c0_9] : memref<16x128xbf16, #tpu.memory_space<vmem>>, vector<16x128xbf16>
    %cst = arith.constant dense<0.000000e+00> : vector<16x128xf32>
    %14 = tpu.matmul %13, %11, %cst {dimension_numbers = #tpu.dot_dimension_numbers<[1], [1], [0], [0], [0, 0, 1, 0], [], []>} : vector<16x128xbf16>, vector<128x128xbf16>, vector<16x128xf32> -> vector<16x128xf32>
    %15 = arith.addf %12, %14 : vector<16x128xf32>
    %c0_10 = arith.constant 0 : index
    %c0_11 = arith.constant 0 : index
    %16 = vector.load %arg8[%c0_10, %c0_11] : memref<16x128xf32, #tpu.memory_space<vmem>>, vector<16x128xf32>
    tpu.vector_store %arg8[%c0_10, %c0_11], %15 {strides = array<i32>} : memref<16x128xf32, #tpu.memory_space<vmem>>, vector<16x128xf32>,
    %c0_i32_12 = arith.constant 0 : i32
    %17 = arith.cmpi eq, %arg2, %c0_i32_12 : i32
    %18 = arith.extui %17 : i1 to i32
    %c0_i32_13 = arith.constant 0 : i32
    %19 = arith.cmpi ne, %18, %c0_i32_13 : i32
    scf.if %19 {
      %c0_14 = arith.constant 0 : index
      %c0_15 = arith.constant 0 : index
      %20 = vector.load %arg7[%c0_14, %c0_15] : memref<3x128xf32, #tpu.memory_space<vmem>>, vector<3x128xf32>
      %c0_16 = arith.constant 0 : index
      %c0_17 = arith.constant 0 : index
      %21 = vector.load %arg8[%c0_16, %c0_17] : memref<16x128xf32, #tpu.memory_space<vmem>>, vector<16x128xf32>
      %22 = vector.extract_strided_slice %20 {offsets = [0, 0], sizes = [1, 128], strides = [1, 1]} : vector<3x128xf32> to vector<1x128xf32>
      %23 = vector.extract_strided_slice %20 {offsets = [1, 0], sizes = [1, 128], strides = [1, 1]} : vector<3x128xf32> to vector<1x128xf32>
      %24 = vector.extract_strided_slice %20 {offsets = [2, 0], sizes = [1, 128], strides = [1, 1]} : vector<3x128xf32> to vector<1x128xf32>
      %25 = arith.mulf %23, %24 : vector<1x128xf32>
      %26 = arith.addf %22, %25 : vector<1x128xf32>
      %27 = vector.broadcast %26 : vector<1x128xf32> to vector<16x128xf32>
      %28 = arith.addf %21, %27 : vector<16x128xf32>
      %c0_18 = arith.constant 0 : index
      %c0_19 = arith.constant 0 : index
      %29 = vector.load %arg8[%c0_18, %c0_19] : memref<16x128xf32, #tpu.memory_space<vmem>>, vector<16x128xf32>
      tpu.vector_store %arg8[%c0_18, %c0_19], %28 {strides = array<i32>} : memref<16x128xf32, #tpu.memory_space<vmem>>, vector<16x128xf32>,
    } else {
    }
    return
  }
  func.func @transform_0(%arg0: i32, %arg1: i32, %arg2: i32) -> (i32, i32) {
    %c0_i32 = arith.constant 0 : i32
    return %arg0, %arg2 : i32, i32
  }
  func.func @transform_1(%arg0: i32, %arg1: i32, %arg2: i32) -> (i32, i32) {
    %c0_i32 = arith.constant 0 : i32
    return %arg1, %arg2 : i32, i32
  }
  func.func @transform_2(%arg0: i32, %arg1: i32, %arg2: i32) -> (i32, i32) {
    %c0_i32 = arith.constant 0 : i32
    return %arg1, %arg2 : i32, i32
  }
  func.func @transform_3(%arg0: i32, %arg1: i32, %arg2: i32) -> (i32, i32) {
    %c0_i32 = arith.constant 0 : i32
    return %arg1, %arg2 : i32, i32
  }
  func.func @transform_4(%arg0: i32, %arg1: i32, %arg2: i32) -> (i32, i32) {
    %c0_i32 = arith.constant 0 : i32
    %c0_i32_0 = arith.constant 0 : i32
    return %c0_i32, %arg1 : i32, i32
  }
  func.func @transform_5(%arg0: i32, %arg1: i32, %arg2: i32) -> (i32, i32) {
    %c0_i32 = arith.constant 0 : i32
    return %arg0, %arg1 : i32, i32
  }
}

</mosaic_0001>

<bundles_post_ra>
// kernel: noisy_linear.1
= control target key start
LH: loop header
LB: loop body
LE: loop exit
PB: predicated region body
PF: predicated region fallthrough
CT: control target
= control target key end

     0   :  { %s450_s1 = inlined_call_operand.vmem [shape: bf16[128,128], index: 1, kind: input, shape index: {}]   ;;  %s451_s2 = inlined_call_operand.vmem [shape: bf16[128,128], index: 2, kind: input, shape index: {}]   ;;  %s452_s3 = inlined_call_operand.vmem [shape: bf16[128,128], index: 3, kind: input, shape index: {}]   ;;  %s453_s0 = inlined_call_operand.vmem [shape: bf16[16,128], index: 0, kind: input, shape index: {}]   ;;  %s454_s4 = inlined_call_operand.vmem [shape: f32[3,128], index: 4, kind: input, shape index: {}]   ;;  %s455_s5 = inlined_call_operand.vmem [shape: f32[16,128], index: 5, kind: output, shape index: {}]  }
   0x1   :  { %v320_v0 = vld [vmem:[%s450_s1 + $0x38] sm:$0xff]   ;;  %v326_v5 = vld [vmem:[%s451_s2 + $0x30] sm:$0xff]   ;;  %v325_v24 = vld [vmem:[%s451_s2 + $0x28] sm:$0xff]  }
   0x2   :  { %v327_v1 = vld [vmem:[%s451_s2 + $0x38] sm:$0xff]   ;;  %v333_v6 = vld [vmem:[%s452_s3 + $0x30] sm:$0xff]   ;;  %v248_v7 = vunpack.c.l.bf16 %v320_v0  ;;  %v249_v8 = vunpack.c.h.bf16 %v320_v0  ;;  %v276_v12 = vunpack.c.l.bf16 %v326_v5  ;;  %v277_v13 = vunpack.c.h.bf16 %v326_v5  ;;  %v332_v25 = vld [vmem:[%s452_s3 + $0x28] sm:$0xff]  }
   0x3   :  { %v334_v2 = vld [vmem:[%s452_s3 + $0x38] sm:$0xff]   ;;  %v280_v3 = vunpack.c.l.bf16 %v327_v1  ;;  %v281_v4 = vunpack.c.h.bf16 %v327_v1  ;;  %v319_v11 = vld [vmem:[%s450_s1 + $0x30] sm:$0xff]   ;;  %v308_v14 = vunpack.c.l.bf16 %v333_v6  ;;  %v309_v15 = vunpack.c.h.bf16 %v333_v6  ;;  %v318_v31 = vld [vmem:[%s450_s1 + $0x28] sm:$0xff]  }
   0x4   :  { %v312_v9 = vunpack.c.l.bf16 %v334_v2  ;;  %v313_v10 = vunpack.c.h.bf16 %v334_v2  ;;  %v244_v18 = vunpack.c.l.bf16 %v319_v11  ;;  %v245_v19 = vunpack.c.h.bf16 %v319_v11  ;;  %v324_v39 = vld [vmem:[%s451_s2 + $0x20] sm:$0xff]   ;;  %v323_v53 = vld [vmem:[%s451_s2 + $0x18] sm:$0xff]  }
   0x5   :  { %v134_v22 = vmul.f32 %v308_v14, %v276_v12  ;;  %v135_v23 = vmul.f32 %v309_v15, %v277_v13  ;;  %v272_v27 = vunpack.c.l.bf16 %v325_v24  ;;  %v273_v28 = vunpack.c.h.bf16 %v325_v24  ;;  %v331_v40 = vld [vmem:[%s452_s3 + $0x20] sm:$0xff]   ;;  %v330_v54 = vld [vmem:[%s452_s3 + $0x18] sm:$0xff]  }
   0x6   :  { %v136_v16 = vmul.f32 %v312_v9, %v280_v3  ;;  %v137_v17 = vmul.f32 %v313_v10, %v281_v4  ;;  %v304_v32 = vunpack.c.l.bf16 %v332_v25  ;;  %v305_v33 = vunpack.c.h.bf16 %v332_v25  ;;  %v317_v45 = vld [vmem:[%s450_s1 + $0x20] sm:$0xff]   ;;  %v316_v59 = vld [vmem:[%s450_s1 + $0x18] sm:$0xff]   ;;  %v322_v3 = vld [vmem:[%s451_s2 + $0x10] sm:$0xff]  }
   0x7   :  { %v150_v29 = vadd.f32 %v244_v18, %v134_v22  ;;  %v151_v30 = vadd.f32 %v245_v19, %v135_v23  ;;  %v240_v34 = vunpack.c.l.bf16 %v318_v31  ;;  %v241_v36 = vunpack.c.h.bf16 %v318_v31  ;;  %v329_v4 = vld [vmem:[%s452_s3 + $0x10] sm:$0xff]   ;;  %v328_v18 = vld [vmem:[%s452_s3 + $0x8] sm:$0xff]   ;;  %v251_v31 = vld [vmem:[%s451_s2] sm:$0xff]  }
   0x8   :  { %v152_v20 = vadd.f32 %v248_v7, %v136_v16  ;;  %v153_v21 = vadd.f32 %v249_v8, %v137_v17  ;;  %v132_v37 = vmul.f32 %v304_v32, %v272_v27  ;;  %v133_v38 = vmul.f32 %v305_v33, %v273_v28  ;;  %v315_v9 = vld [vmem:[%s450_s1 + $0x10] sm:$0xff]   ;;  %v321_v17 = vld [vmem:[%s451_s2 + $0x8] sm:$0xff]   ;;  %v283_v32 = vld [vmem:[%s452_s3] sm:$0xff]  }
   0x9   :  { %v160_v35 = vpack.c.bf16 %v151_v30, %v150_v29  ;;  %v268_v41 = vunpack.c.l.bf16 %v324_v39  ;;  %v269_v42 = vunpack.c.h.bf16 %v324_v39  ;;  %v300_v46 = vunpack.c.l.bf16 %v331_v40  ;;  %v314_v25 = vld [vmem:[%s450_s1 + $0x8] sm:$0xff]   ;;  %v219_v39 = vld [vmem:[%s450_s1] sm:$0xff]  }
   0xa   :  { %v161_v26 = vpack.c.bf16 %v153_v21, %v152_v20  ;;  %v148_v43 = vadd.f32 %v240_v34, %v132_v37  ;;  %v149_v44 = vadd.f32 %v241_v36, %v133_v38  ;;  %v301_v47 = vunpack.c.h.bf16 %v331_v40 }
   0xb   :  { %v236_v48 = vunpack.c.l.bf16 %v317_v45  ;;  %v237_v50 = vunpack.c.h.bf16 %v317_v45  ;;  %v130_v51 = vmul.f32 %v300_v46, %v268_v41  ;;  %v264_v55 = vunpack.c.l.bf16 %v323_v53 }
   0xc   :  { %172 = vmatpush.bf16.xpose.msra.mxu0 %v161_v26  ;;  %v159_v49 = vpack.c.bf16 %v149_v44, %v148_v43  ;;  %v131_v52 = vmul.f32 %v301_v47, %v269_v42  ;;  %v265_v56 = vunpack.c.h.bf16 %v323_v53  ;;  %v296_v60 = vunpack.c.l.bf16 %v330_v54 }
   0xd   :  { %v146_v57 = vadd.f32 %v236_v48, %v130_v51  ;;  %v297_v61 = vunpack.c.h.bf16 %v330_v54  ;;  %v232_v62 = vunpack.c.l.bf16 %v316_v59  ;;  %v233_v0 = vunpack.c.h.bf16 %v316_v59  ;;  %v217_v48 = vld [vmem:[%s453_s0] sm:$0xff] }
   0xe   :  { %v147_v58 = vadd.f32 %v237_v50, %v131_v52  ;;  %v128_v1 = vmul.f32 %v296_v60, %v264_v55  ;;  %v260_v5 = vunpack.c.l.bf16 %v322_v3  ;;  %v261_v6 = vunpack.c.h.bf16 %v322_v3 }
   0xf   :  { %v129_v2 = vmul.f32 %v297_v61, %v265_v56  ;;  %v292_v10 = vunpack.c.l.bf16 %v329_v4  ;;  %v293_v11 = vunpack.c.h.bf16 %v329_v4  ;;  %v228_v12 = vunpack.c.l.bf16 %v315_v9 }
  0x10   :  { %v158_v63 = vpack.c.bf16 %v147_v58, %v146_v57  ;;  %v144_v7 = vadd.f32 %v232_v62, %v128_v1  ;;  %v229_v14 = vunpack.c.h.bf16 %v315_v9  ;;  %v256_v19 = vunpack.c.l.bf16 %v321_v17 }
  0x11   :  { %v145_v8 = vadd.f32 %v233_v0, %v129_v2  ;;  %v126_v15 = vmul.f32 %v292_v10, %v260_v5  ;;  %v127_v16 = vmul.f32 %v293_v11, %v261_v6  ;;  %v257_v20 = vunpack.c.h.bf16 %v321_v17 }
  0x12   :  { %v288_v21 = vunpack.c.l.bf16 %v328_v18  ;;  %v289_v22 = vunpack.c.h.bf16 %v328_v18  ;;  %v224_v26 = vunpack.c.l.bf16 %v314_v25  ;;  %v225_v27 = vunpack.c.h.bf16 %v314_v25 }
  0x13   :  { %v157_v13 = vpack.c.bf16 %v145_v8, %v144_v7  ;;  %v142_v23 = vadd.f32 %v228_v12, %v126_v15  ;;  %v143_v24 = vadd.f32 %v229_v14, %v127_v16  ;;  %v253_v36 = vunpack.c.h.bf16 %v251_v31 }
  0x14   :  { %173 = vmatpush.bf16.xpose.msra.mxu0 %v160_v35  ;;  %v124_v28 = vmul.f32 %v288_v21, %v256_v19  ;;  %v125_v29 = vmul.f32 %v289_v22, %v257_v20  ;;  %v252_v35 = vunpack.c.l.bf16 %v251_v31  ;;  %v284_v37 = vunpack.c.l.bf16 %v283_v32 }
  0x15   :  { %v156_v30 = vpack.c.bf16 %v143_v24, %v142_v23  ;;  %v285_v38 = vunpack.c.h.bf16 %v283_v32  ;;  %v220_v41 = vunpack.c.l.bf16 %v219_v39  ;;  %v221_v42 = vunpack.c.h.bf16 %v219_v39 }
  0x16   :  { %v140_v33 = vadd.f32 %v224_v26, %v124_v28  ;;  %v141_v34 = vadd.f32 %v225_v27, %v125_v29  ;;  %v122_v43 = vmul.f32 %v284_v37, %v252_v35 }
  0x17   :  { %v123_v44 = vmul.f32 %v285_v38, %v253_v36 }
  0x18   :  { %v155_v40 = vpack.c.bf16 %v141_v34, %v140_v33  ;;  %v138_v45 = vadd.f32 %v220_v41, %v122_v43 }
  0x19   :  { %v139_v46 = vadd.f32 %v221_v42, %v123_v44 }
  0x1b   :  { %v154_v47 = vpack.c.bf16 %v139_v46, %v138_v45 }
  0x1c   :  { %174 = vmatpush.bf16.xpose.msra.mxu0 %v159_v49  ;;  %v193_v49 = vld [vmem:[%s454_s4] sm:$0x7] }
  0x1d   :  { %v197_v50 = vrot.slane %v193_v49, 1 }
  0x1f   :  { %v199_v51 = vmul.f32 %v197_v50, %v193_v49 }
  0x21   :  { %v201_v52 = vrot.slane %v199_v51, 1 }
  0x23   :  { %v203_v53 = vadd.f32 %v201_v52, %v193_v49 }
  0x24   :  { %175 = vmatpush.bf16.xpose.msra.mxu0 %v158_v63 }
  0x25   :  { %v204_v54 = vperm.slane %v203_v53, 0 }
  0x2c   :  { %176 = vmatpush.bf16.xpose.msra.mxu0 %v157_v13 }
  0x34   :  { %177 = vmatpush.bf16.xpose.msra.mxu0 %v156_v30 }
  0x3c   :  { %178 = vmatpush.bf16.xpose.msra.mxu0 %v155_v40 }
  0x44   :  { %179 = vmatpush.bf16.xpose.msra.mxu0 %v154_v47 }
  0x4b   :  { %180 = vmatmul.bf16.vlgmr.msra.gmra.mxu0 %v217_v48 }
  0xc8   :  { %v181_v55 = vpop.f32.mrf.mxu0 }
  0xc9   :  { %v205_v56 = vadd.f32 %v204_v54, %v181_v55 }
  0xcb   :  { %207 = vst [vmem:[%s455_s5] sm:$0xff] %v205_v56 }
  0xd0   :  { %v183_v57 = vpop.f32.mrf.mxu0 }
  0xd1   :  { %v206_v58 = vadd.f32 %v204_v54, %v183_v57 }
  0xd3   :  { %208 = vst [vmem:[%s455_s5 + $0x8] sm:$0xff] %v206_v58 }

</bundles_post_ra>
